<compile_context>
chip_gen: v7x
topology: tpu7x:2x2x1
jax: 0.10.0
libtpu: 0.0.40
codegen_flags: <defaults>
</compile_context>

<pallas_src>
import jax
import jax.numpy as jnp
from jax.experimental import pallas as pl
from jax.experimental.pallas import tpu as pltpu

EPS = 1e-6


def _llama_rmsnorm_kernel(x_ref, alpha_ref, beta_ref, o_ref):
    # x_ref: (TILE_ROWS, HIDDEN); alpha/beta: (1, HIDDEN) already f32.
    x = x_ref[...].astype(jnp.float32)
    n = x.shape[-1]
    # Single traversal for both moments (one read of the f32 tile).
    s1 = jnp.sum(x, axis=-1, keepdims=True)          # (R, 1)
    s2 = jnp.sum(x * x, axis=-1, keepdims=True)      # (R, 1)
    mean = s1 * jnp.float32(1.0 / n)
    # Unbiased (ddof=1) variance: sum((x-mean)^2) = s2 - mean*s1.
    # hidden == 1 would divide by 0 (torch gives NaN); clamp denom -> output=beta.
    denom = jnp.float32(max(n - 1, 1))
    var = jnp.maximum((s2 - mean * s1) / denom, 0.0)  # clamp cancellation noise
    std = jnp.sqrt(var)
    inv = pl.reciprocal(std + jnp.float32(EPS))       # exact per-row reciprocal
    y = alpha_ref[...] * ((x - mean) * inv) + beta_ref[...]
    o_ref[...] = y.astype(o_ref.dtype)


def _sublane_multiple(dtype) -> int:
    # f32 -> 8, bf16 -> 16, int8/fp8 -> 32 (packed sublanes)
    itemsize = jnp.dtype(dtype).itemsize
    return max(8, 32 // itemsize)


def _vmem_capacity_bytes() -> int:
    try:
        return int(pltpu.get_tpu_info().vmem_capacity_bytes)
    except Exception:
        # Conservative fallback (v7x per-TC VMEM) — safe on every generation.
        return 64 << 20


def _bytes_per_row(hidden: int, itemsize: int) -> int:
    # Double-buffered input block + double-buffered output block (raw dtype)
    # plus the live f32 compute intermediates (~2 tiles: x_f32 and y).
    return 4 * hidden * itemsize + 2 * hidden * 4


def _pick_tile_rows(rows, hidden, dtype, *, min_grid_steps=8):
    """Largest row tile that fits the generation-aware VMEM budget while
    keeping enough grid steps for DMA/compute overlap and dual-TC sharding."""
    itemsize = jnp.dtype(dtype).itemsize
    sub = _sublane_multiple(dtype)
    vmem_cap = _vmem_capacity_bytes()
    if vmem_cap <= (64 << 20):          # v7x-class: small physical VMEM
        io_budget = 14 << 20
        max_tile_rows = 512
    else:                               # v5e / v6e: 128 MiB physical VMEM
        io_budget = 32 << 20
        max_tile_rows = 1024
    cap = max(1, io_budget // _bytes_per_row(hidden, itemsize))
    tile = min(rows, cap, max_tile_rows)
    # Keep the grid long enough that double-buffering overlaps DMA with
    # compute, and (on v7x) both TensorCores get row blocks.
    if rows >= min_grid_steps * sub:
        tile = min(tile, rows // min_grid_steps)
    elif rows >= 2 * sub:
        tile = min(tile, rows // 2)
    if tile >= sub:
        tile = (tile // sub) * sub      # sublane-aligned block shape
    else:
        tile = min(rows, sub)           # tiny input: full/ragged block is legal
    return int(max(1, tile))


def llama_rmsnorm(x, alpha, beta, *, tile_rows=None):
    """x: (..., hidden). alpha, beta: (hidden,)."""
    orig_shape = x.shape
    hidden = orig_shape[-1]
    x2d = x.reshape(-1, hidden)
    rows = x2d.shape[0]

    if tile_rows is None:
        tile_rows = _pick_tile_rows(rows, hidden, x.dtype)

    # Pre-cast affine params to f32 once in the wrapper (no per-step casts).
    alpha2d = alpha.reshape(1, hidden).astype(jnp.float32)
    beta2d = beta.reshape(1, hidden).astype(jnp.float32)

    itemsize = jnp.dtype(x.dtype).itemsize
    io_block = tile_rows * hidden * itemsize
    f32_block = tile_rows * hidden * 4
    needed = 2 * io_block          # double-buffered input
    needed += 2 * io_block         # double-buffered output
    needed += 2 * f32_block        # live f32 intermediates (x_f32, y)
    needed += 4 * hidden * 4       # alpha + beta (f32, double-buffered)

    vmem_cap = _vmem_capacity_bytes()
    if needed + (4 << 20) > vmem_cap:
        # TODO(synk): split the hidden axis for extremely large hidden sizes.
        raise ValueError(
            f"hidden={hidden} too large for a single-row-block RMSNorm kernel "
            f"(needs {needed} B of VMEM, capacity {vmem_cap} B)")
    vmem_limit = int(min(vmem_cap, max(needed + (8 << 20), 16 << 20)))

    # cdiv grid; Pallas masks the ragged last block's output (per-row reduce,
    # so garbage rows in the last input block only touch discarded outputs).
    grid = (pl.cdiv(rows, tile_rows),)

    out = pl.pallas_call(
        _llama_rmsnorm_kernel,
        out_shape=jax.ShapeDtypeStruct((rows, hidden), x.dtype),
        grid_spec=pltpu.PrefetchScalarGridSpec(
            num_scalar_prefetch=0,
            grid=grid,
            in_specs=[
                pl.BlockSpec((tile_rows, hidden), lambda i: (i, 0)),
                pl.BlockSpec((1, hidden), lambda i: (0, 0)),
                pl.BlockSpec((1, hidden), lambda i: (0, 0)),
            ],
            out_specs=pl.BlockSpec((tile_rows, hidden), lambda i: (i, 0)),
        ),
        compiler_params=pltpu.CompilerParams(
            dimension_semantics=("parallel",),   # shard rows across v7x's 2 TCs
            vmem_limit_bytes=vmem_limit,
        ),
    )(x2d, alpha2d, beta2d)

    return out.reshape(orig_shape)


if __name__ == "__main__":
    key = jax.random.PRNGKey(0)
    kx, ka, kb = jax.random.split(key, 3)

    # NOTE: hidden=32 (<128 lanes) is for correctness testing only — output
    # stores are lane-masked here; real Llama hidden sizes are >=2048.
    batch, seq, hidden = 2, 8, 32
    x = jax.random.normal(kx, (batch, seq, hidden), dtype=jnp.float32)
    alpha = 1.0 + 0.1 * jax.random.normal(ka, (hidden,), dtype=jnp.float32)
    beta = 0.1 * jax.random.normal(kb, (hidden,), dtype=jnp.float32)

    out = llama_rmsnorm(x, alpha, beta)
    out = jax.block_until_ready(out)

    # Reference in plain JAX (unbiased std, eps added to std, as in the spec).
    mean = jnp.mean(x, axis=-1, keepdims=True)
    std = jnp.std(x, axis=-1, keepdims=True, ddof=1)
    ref = alpha * (x - mean) / (std + EPS) + beta
    assert jnp.allclose(out, ref, atol=1e-5, rtol=1e-5), "mismatch vs reference"

    print("KERNEL_OK")
</pallas_src>

<mosaic_0001>
module attributes {stable_mosaic.version = 11 : i64} {
  func.func @_llama_rmsnorm_kernel(%arg0: i32, %arg1: memref<8x32xf32, #tpu.memory_space<vmem>>, %arg2: memref<1x32xf32, #tpu.memory_space<vmem>>, %arg3: memref<1x32xf32, #tpu.memory_space<vmem>>, %arg4: memref<8x32xf32, #tpu.memory_space<vmem>>) attributes {dimension_semantics = [#tpu.dimension_semantics<parallel>], iteration_bounds = array<i64: 2>, scalar_prefetch = 0 : i64, scratch_operands = 0 : i64, tpu.core_type = #tpu.core_type<tc>, window_params = [{transform_indices = @transform_0, window_bounds = array<i64: 8, 32>}, {pipeline_mode = #tpu.pipeline_mode<synchronous>, transform_indices = @transform_1, window_bounds = array<i64: 1, 32>}, {pipeline_mode = #tpu.pipeline_mode<synchronous>, transform_indices = @transform_2, window_bounds = array<i64: 1, 32>}, {transform_indices = @transform_3, window_bounds = array<i64: 8, 32>}]} {
    %c0 = arith.constant 0 : index
    %c0_0 = arith.constant 0 : index
    %0 = vector.load %arg1[%c0, %c0_0] : memref<8x32xf32, #tpu.memory_space<vmem>>, vector<8x32xf32>
    %cst = arith.constant dense<0.000000e+00> : vector<8xf32>
    %1 = vector.multi_reduction <add>, %0, %cst [1] : vector<8x32xf32> to vector<8xf32>
    %2 = vector.shape_cast %1 : vector<8xf32> to vector<8x1xf32>
    %3 = arith.mulf %0, %0 : vector<8x32xf32>
    %cst_1 = arith.constant dense<0.000000e+00> : vector<8xf32>
    %4 = vector.multi_reduction <add>, %3, %cst_1 [1] : vector<8x32xf32> to vector<8xf32>
    %5 = vector.shape_cast %4 : vector<8xf32> to vector<8x1xf32>
    %cst_2 = arith.constant 3.125000e-02 : f32
    %6 = vector.broadcast %cst_2 : f32 to vector<8x1xf32>
    %7 = arith.mulf %2, %6 : vector<8x1xf32>
    %8 = arith.mulf %7, %2 : vector<8x1xf32>
    %9 = arith.subf %5, %8 : vector<8x1xf32>
    %cst_3 = arith.constant 3.100000e+01 : f32
    %10 = vector.broadcast %cst_3 : f32 to vector<8x1xf32>
    %11 = arith.divf %9, %10 : vector<8x1xf32>
    %cst_4 = arith.constant 0.000000e+00 : f32
    %12 = vector.broadcast %cst_4 : f32 to vector<8x1xf32>
    %13 = arith.maximumf %11, %12 : vector<8x1xf32>
    %14 = math.sqrt %13 : vector<8x1xf32>
    %cst_5 = arith.constant 9.99999997E-7 : f32
    %15 = vector.broadcast %cst_5 : f32 to vector<8x1xf32>
    %16 = arith.addf %14, %15 : vector<8x1xf32>
    %17 = tpu.reciprocal %16 : vector<8x1xf32> -> vector<8x1xf32>
    %c0_6 = arith.constant 0 : index
    %c0_7 = arith.constant 0 : index
    %18 = vector.load %arg2[%c0_6, %c0_7] : memref<1x32xf32, #tpu.memory_space<vmem>>, vector<1x32xf32>
    %19 = vector.broadcast %7 : vector<8x1xf32> to vector<8x32xf32>
    %20 = arith.subf %0, %19 : vector<8x32xf32>
    %21 = vector.broadcast %17 : vector<8x1xf32> to vector<8x32xf32>
    %22 = arith.mulf %20, %21 : vector<8x32xf32>
    %23 = vector.broadcast %18 : vector<1x32xf32> to vector<8x32xf32>
    %24 = arith.mulf %23, %22 : vector<8x32xf32>
    %c0_8 = arith.constant 0 : index
    %c0_9 = arith.constant 0 : index
    %25 = vector.load %arg3[%c0_8, %c0_9] : memref<1x32xf32, #tpu.memory_space<vmem>>, vector<1x32xf32>
    %26 = vector.broadcast %25 : vector<1x32xf32> to vector<8x32xf32>
    %27 = arith.addf %24, %26 : vector<8x32xf32>
    %c0_10 = arith.constant 0 : index
    %c0_11 = arith.constant 0 : index
    %28 = vector.load %arg4[%c0_10, %c0_11] : memref<8x32xf32, #tpu.memory_space<vmem>>, vector<8x32xf32>
    tpu.vector_store %arg4[%c0_10, %c0_11], %27 {strides = array<i32>} : memref<8x32xf32, #tpu.memory_space<vmem>>, vector<8x32xf32>,
    return
  }
  func.func @transform_0(%arg0: i32) -> (i32, i32) {
    %c0_i32 = arith.constant 0 : i32
    %c0_i32_0 = arith.constant 0 : i32
    return %arg0, %c0_i32 : i32, i32
  }
  func.func @transform_1(%arg0: i32) -> (i32, i32) {
    %c0_i32 = arith.constant 0 : i32
    %c0_i32_0 = arith.constant 0 : i32
    %c0_i32_1 = arith.constant 0 : i32
    return %c0_i32, %c0_i32_0 : i32, i32
  }
  func.func @transform_2(%arg0: i32) -> (i32, i32) {
    %c0_i32 = arith.constant 0 : i32
    %c0_i32_0 = arith.constant 0 : i32
    %c0_i32_1 = arith.constant 0 : i32
    return %c0_i32, %c0_i32_0 : i32, i32
  }
  func.func @transform_3(%arg0: i32) -> (i32, i32) {
    %c0_i32 = arith.constant 0 : i32
    %c0_i32_0 = arith.constant 0 : i32
    return %arg0, %c0_i32 : i32, i32
  }
}

</mosaic_0001>

<bundles_post_ra>
// kernel: tpu_custom_call.1
= control target key start
LH: loop header
LB: loop body
LE: loop exit
PB: predicated region body
PF: predicated region fallthrough
CT: control target
= control target key end

     0   :  { %8 = vsyncpa [#allocation3], 0  ;;  %s671_s0 = inlined_call_operand.hbm [shape: f32[16,32], index: 0, kind: input, shape index: {}]   ;;  %s672_s1 = inlined_call_operand.vmem [shape: f32[1,32], index: 1, kind: input, shape index: {}]   ;;  %s673_s2 = inlined_call_operand.vmem [shape: f32[1,32], index: 2, kind: input, shape index: {}]   ;;  %s674_s3 = inlined_call_operand.hbm [shape: f32[16,32], index: 3, kind: output, shape index: {}]  }
   0x1   :  { %10 = vsyncpa [#allocation3 + $0x1], 0 }
   0x2   :  { %11 = vsyncpa [#allocation4], 0 }
   0x3   :  { %13 = vsyncpa [#allocation4 + $0x1], 0  ;;  %s497_s12 = smov 0   ;;  %s499_s13 = smov 0  }
   0x4   :  { %s501_s14 = smov 0   ;;  %s503_s15 = smov 0  }
   0x5 LB: > { %s518_s16 = sadd.s32 4294967295, %s473_s15   ;;  %s313_s17 = sadd.s32 4294967294, %s473_s15   ;;  %s473_s15 = sphi %s503_s15, %s689_s15   ;;  %s469_s14 = sphi %s501_s14, %s688_s14   ;;  %s465_s13 = sphi %s499_s13, %s687_s13   ;;  %s461_s12 = sphi %s497_s12, %s686_s12  }
   0x6   : > { %s522_s18 = sadd.s32 1, %s473_s15   ;;  %s26_s19 = sadd.s32 1, %s469_s14 }
   0x7   : > { %s23_s20 = ssub.s32 %s473_s15, %s522_s18  ;;  %p33_p0 = scmp.ne.s32.totalorder %s469_s14, %s465_s13 }
   0x8   : > { %p24_p1 = scmp.eq.s32.totalorder %s23_s20, 0  ;;  %p34_p2 = scmp.eq.s32.totalorder %s473_s15, 0 }
   0x9   : > { %p39_p3 = scmp.ne.s32.totalorder %s465_s13, %s461_s12  ;;  %p40_p4 = scmp.eq.s32.totalorder %s518_s16, 0 }
   0xa   : > { %s534_s21 = scalar_select %p24_p1, %s469_s14, %s26_s19  }
   0xb   : > { %p536_p5 = por %p34_p2, %p33_p0  ;;  %p540_p6 = por %p40_p4, %p39_p3 }
   0xc   : > { %p105_p7 = scmp.eq.s32.totalorder %s518_s16, 1  ;;  %p111_p8 = scmp.eq.s32.totalorder %s313_s17, 1 }
   0xd   : > { %p339_p10 = scmp.lt.s32.totalorder %s473_s15, 2  ;;  %s137_s26 = sand.u32 1, %s469_s14  }
   0xe   : > { %p547_p11 = por %p105_p7, %p33_p0  ;;  %p551_p12 = por %p111_p8, %p39_p3 }
   0xf   : > { %s317_s27 = sshll.u32 %s473_s15, 7  ;;  %s316_s28 = sshll.u32 %s137_s26, 3 }
  0x10   : > { %s678_s24 = scalar_select %p547_p11, 1, 0 }
  0x11   : > { %s679_s25 = scalar_select %p551_p12, 1, 0 }
  0x12   : > { %s560_s4 = scalar_lea.hbm %s671_s0, %s317_s27  ;;  %s141_s5 = scalar_lea.vmem [#allocation2], %s316_s28 }
  0x13   : > { %s148_s6 = sshll.u32 %s141_s5, 4  ;;  %p564_p13 = pnand %p339_p10, %p536_p5  ;;  %s568_s6 = int_to_ptr.vmem [resolvable:$true] %s148_s6 }
  0x14   : > { %s138_s8 = scalar_lea.sflag [#allocation3], %s137_s26  ;;  %s377_s9 = scalar_lea.hbm %s560_s4, 128 }
  0x15   : > { %p378_p2 = scmp.ne.s32.totalorder %s560_s4, %s377_s9  ;;  %p379_p3 = pneg %p564_p13 }
  0x16   : > { %s382_s17 = scalar_lea.hbm %s671_s0, 256  ;;  %p383_p5 = scmp.lt.u32.totalorder %s560_s4, %s671_s0 }
  0x17   : > { %p380_p4 = pnand %p379_p3, %p378_p2  ;;  %p384_p8 = scmp.lt.u32.totalorder %s382_s17, %s377_s9 }
  0x18   : > { %p386_p9 = scmp.lt.u32.totalorder %s377_s9, %s560_s4 }
  0x19   : > { %p381_p7 = pneg %p380_p4  ;;  %p385_p10 = por %p384_p8, %p383_p5 }
  0x1b   : > { %p387_p0 = por %p386_p9, %p385_p10 }
  0x1d   : > { %p388_p1 = pnand %p387_p0, %p381_p7 }
  0x1f   : > { %391 = shalt.err (!%p388_p1)
}
  0x20   : > { %s392_s22 = scalar_lea.vmem %s568_s6, 128  ;;  %s475_s26 = smov [#allocation2]  }
  0x21   : > { %p393_p2 = scmp.ne.s32.totalorder %s568_s6, %s392_s22  ;;  %s397_s27 = sshll.u32 %s475_s26, 4  ;;  %s398_s27 = int_to_ptr.vmem [resolvable:$false] %s397_s27 }
  0x22   : > { %s399_s28 = scalar_lea.vmem %s398_s27, 256  ;;  %p400_p11 = scmp.lt.s32.totalorder %s568_s6, %s398_s27 }
  0x23   : > { %p395_p4 = pnand %p393_p2, %p379_p3  ;;  %p401_p5 = scmp.lt.s32.totalorder %s399_s28, %s392_s22 }
  0x25   : > { %p396_p12 = pneg %p395_p4  ;;  %p402_p8 = por %p401_p5, %p400_p11 }
  0x27   : > { %p403_p9 = pnand %p402_p8, %p396_p12 }
  0x29   : > { %406 = shalt.err (!%p403_p9)
}
  0x2a   : > { %334 = dma.hbm_to_vmem [thread:$0]  (!%p564_p13), %s560_s4, 128, %s568_s6, %s138_s8  }
  0x2b   : > { %p681_p0 = scmp.lt.s32.totalorder %s473_s15, 3  ;;  %p682_p1 = scmp.ge.s32.totalorder %s473_s15, 1 }
  0x2d   : > { %p154_p3 = pnand %p682_p1, %p681_p0 }
  0x2e   : > { %s602_s29 = sand.u32 (!%p154_p3), 1, %s465_s13  }
  0x2f   : > { %157 = sbr.rel (%p154_p3) target bundleno = 257 (0x101), region = 32  ;;  %s319_s30 = sshll.u32 (!%p154_p3), %s602_s29, 3 }
  0x30   : > { %s160_s5 = scalar_lea.sflag (!%p154_p3), [#allocation3], %s602_s29  ;;  %s163_s7 = scalar_lea.vmem (!%p154_p3), [#allocation2], %s319_s30 }
  0x36   : > { %452 = dma.done.wait (%p540_p6), %s160_s5, 128  }
  0x37   : > { %454 = vsyncadd (%p540_p6), %s160_s5, 4294967168  ;;  %vm187_vm0 = vcmask 261120   ;;  %v186_v0 = vld [vmem:[%s163_s7] sm:$0xff]  ;;  %s324_s9 = sshll.u32 %s518_s16, 7  ;;  %s185_s10 = scalar_lea.vmem [#allocation5], %s319_s30 }
  0x38   : > { %v188_v1 = vsel %vm187_vm0, %v186_v0, 0.0  ;;  %v191_v2 = vmul.f32 %v186_v0, %v186_v0  ;;  %v321_v19 = vld [vmem:[%s672_s1] ss:$0 sm:$0xff]  ;;  %s243_s11 = sshll.u32 %s185_s10, 4  ;;  %s626_s20 = scalar_lea.hbm %s674_s3, %s324_s9  ;;  %s628_s11 = int_to_ptr.vmem [resolvable:$true] %s243_s11 }
  0x39   : > { %189 = vadd.xlane.f32.xlu0 %v188_v1  ;;  %v322_v21 = vld [vmem:[%s673_s2] ss:$0 sm:$0xff]  ;;  %s230_s22 = scalar_lea.sflag [#allocation4], %s602_s29  ;;  %s407_s26 = scalar_lea.vmem %s628_s11, 128 }
  0x3a   : > { %v192_v3 = vsel %vm187_vm0, %v191_v2, 0.0  ;;  %p408_p6 = scmp.ne.s32.totalorder %s628_s11, %s407_s26  ;;  %p683_p11 = scmp.ne.s32.totalorder %s678_s24, 0 }
  0x3b   : > { %s476_s16 = smov [#allocation5]  }
  0x3c   : > { %p409_p12 = pnand %p408_p6, %p683_p11  ;;  %s411_s27 = sshll.u32 %s476_s16, 4  ;;  %s412_s27 = int_to_ptr.vmem [resolvable:$false] %s411_s27 }
  0x3d   : > { %193 = vadd.xlane.f32.xlu0 %v192_v3  ;;  %s413_s28 = scalar_lea.vmem %s412_s27, 256  ;;  %p414_p7 = scmp.lt.s32.totalorder %s628_s11, %s412_s27 }
  0x3e   : > { %p410_p13 = pneg %p409_p12  ;;  %p415_p10 = scmp.lt.s32.totalorder %s413_s28, %s407_s26 }
  0x40   : > { %p416_p2 = por %p415_p10, %p414_p7 }
  0x42   : > { %p417_p4 = pnand %p416_p2, %p410_p13 }
  0xc6   : > { %v190_v4 = vpop.xlane.xlu0 %189 }
  0xc7   : > { %v195_v5 = vmul.f32 0.03125, %v190_v4 }
  0xc9   : > { %v196_v6 = vmul.f32 %v195_v5, %v190_v4  ;;  %v211_v17 = vsub.f32 %v186_v0, %v195_v5 }
  0xca   : > { %v194_v7 = vpop.xlane.xlu0 %193 }
  0xcb   : > { %v197_v8 = vsub.f32 %v194_v7, %v196_v6 }
  0xcd   : > { %v199_v9 = vmul.f32 0.032258064, %v197_v8 }
  0xcf   : > { %v200_v10 = vmax.f32 %v199_v9, 0.0 }
  0xd1   : > { %373 = vrsqrt.f32 %v200_v10  ;;  %vm203_vm1 = vcmp.eq.f32.partialorder %v200_v10, inf  ;;  %v206_v13 = vand.u32 2147483648, %v200_v10  ;;  %vm205_vm2 = vcmp.eq.f32.partialorder %v200_v10, 0.0 }
  0xdb   : > { %v374_v11 = vpop.eup %373 }
  0xdc   : > { %v202_v12 = vmul.f32 %v374_v11, %v200_v10 }
  0xde   : > { %v204_v14 = vsel %vm203_vm1, %v200_v10, %v202_v12 }
  0xdf   : > { %v207_v15 = vsel %vm205_vm2, %v206_v13, %v204_v14 }
  0xe0   : > { %v208_v16 = vadd.f32 1e-06, %v207_v15 }
  0xe2   : > { %375 = vrcp.f32 %v208_v16 }
  0xec   : > { %v376_v18 = vpop.eup %375 }
  0xed   : > { %v212_v20 = vmul.f32 %v376_v18, %v211_v17 }
  0xef   : > { %v219_v22 = vmul.f32 %v321_v19, %v212_v20 }
  0xf1   : > { %v227_v23 = vadd.f32 %v322_v21, %v219_v22 }
  0xf3   : > { %228 = vst.msk [vmem:[%s185_s10] sm:$0xff] %vm187_vm0, %v227_v23 }
  0xf4   : > { %420 = shalt.err (!%p417_p4)
}
  0xf5   : > { %s421_s29 = scalar_lea.hbm %s626_s20, 128  ;;  %s425_s7 = scalar_lea.hbm %s674_s3, 256 }
  0xf6   : > { %p422_p5 = scmp.ne.s32.totalorder %s626_s20, %s421_s29  ;;  %p426_p0 = scmp.lt.u32.totalorder %s626_s20, %s674_s3 }
  0xf7   : > { %p427_p1 = scmp.lt.u32.totalorder %s425_s7, %s421_s29  ;;  %p429_p6 = scmp.lt.u32.totalorder %s421_s29, %s626_s20 }
  0xf8   : > { %p423_p8 = pnand %p422_p5, %p683_p11 }
  0xf9   : > { %p428_p3 = por %p427_p1, %p426_p0 }
  0xfa   : > { %p424_p9 = pneg %p423_p8 }
  0xfb   : > { %p430_p12 = por %p429_p6, %p428_p3 }
  0xfd   : > { %p431_p13 = pnand %p430_p12, %p424_p9 }
  0xff   : > { %434 = shalt.err (!%p431_p13)
}
 0x100   : > { %329 = dma.vmem_to_hbm [thread:$0]  (%p683_p11), %s628_s11, 128, %s626_s20, %s230_s22  }
 0x101 PF: > { %s255_s6 = sand.u32 1, %s461_s12   ;;  %p684_p7 = scmp.ne.s32.totalorder %s679_s25, 0 }
 0x102   : > { %p685_p10 = scmp.ge.s32.totalorder %s473_s15, 2  ;;  %s256_s8 = scalar_lea.sflag [#allocation4], %s255_s6 }
 0x104   : > { %p336_p2 = pnand %p685_p10, %p684_p7 }
 0x106   : > { %456 = dma.done.wait (!%p336_p2), %s256_s8, 128  }
 0x107   : > { %458 = vsyncadd (!%p336_p2), %s256_s8, 4294967168  ;;  %p16_p4 = scmp.ge.s32.totalorder %s522_s18, 4   ;;  %s686_s12 = smov %s465_s13 }
 0x108   : > { %s687_s13 = smov %s469_s14  ;;  %s688_s14 = smov %s534_s21 }
 0x109   : > { %s689_s15 = smov %s522_s18  ;;  %18 = sbr.rel (!%p16_p4) target bundleno = 5 (0x5), region = 77 }
 0x110   :  { %261 = vsyncpa [#allocation3], 1 }
 0x111   :  { %263 = vsyncpa [#allocation3 + $0x1], 1 }
 0x112   :  { %264 = vsyncpa [#allocation4], 1 }
 0x113   :  { %266 = vsyncpa [#allocation4 + $0x1], 1 }

</bundles_post_ra>
